<compile_context>
chip_gen: v7x
topology: tpu7x:2x2x1
jax: 0.10.0
libtpu: 0.0.40
codegen_flags: <defaults>
</compile_context>

<pallas_src>
import functools

import jax
import jax.numpy as jnp
from jax import lax
from jax.experimental import pallas as pl
from jax.experimental.pallas import tpu as pltpu

F32 = jnp.float32
BF16 = jnp.bfloat16
_VMEM_LIMIT = 32 * 1024 * 1024   # safe scoped-VMEM budget on v5e / v6e / v7x


def _params(sem):
    return pltpu.CompilerParams(dimension_semantics=sem,
                                vmem_limit_bytes=_VMEM_LIMIT)


def _row_tile(n, target=256):
    """Tile for a second-to-last block dim: multiple of 8 that divides n, or full dim."""
    if n <= target:
        return n
    t = (target // 8) * 8
    while t >= 8:
        if n % t == 0:
            return t
        t -= 8
    return n


def _col_tile(n, target=512):
    """Tile for a last (lane) block dim: multiple of 128 that divides n, or full dim."""
    if n <= target:
        return n
    t = (target // 128) * 128
    while t >= 128:
        if n % t == 0:
            return t
        t -= 128
    return n


# ----------------------------------------------------------------------------
# Fused 2-layer MLP  (nn.Sequential(Linear, ReLU, Linear))
# ----------------------------------------------------------------------------
def _mlp2_kernel(x_ref, w1_ref, b1_ref, w2_ref, b2_ref, o_ref):
    x = x_ref[...].astype(BF16)
    h = jnp.dot(x, w1_ref[...].astype(BF16), preferred_element_type=F32) + b1_ref[...]
    h = jnp.maximum(h, 0.0)
    o = jnp.dot(h.astype(BF16), w2_ref[...].astype(BF16),
                preferred_element_type=F32) + b2_ref[...]
    o_ref[...] = o


def mlp2(x, w1, b1, w2, b2):
    m, d_in = x.shape
    d_h = w1.shape[1]
    d_out = w2.shape[1]
    tm = _row_tile(m)
    return pl.pallas_call(
        _mlp2_kernel,
        out_shape=jax.ShapeDtypeStruct((m, d_out), F32),
        grid=(m // tm,),
        in_specs=[
            pl.BlockSpec((tm, d_in), lambda i: (i, 0)),
            pl.BlockSpec((d_in, d_h), lambda i: (0, 0)),
            pl.BlockSpec((1, d_h), lambda i: (0, 0)),
            pl.BlockSpec((d_h, d_out), lambda i: (0, 0)),
            pl.BlockSpec((1, d_out), lambda i: (0, 0)),
        ],
        out_specs=pl.BlockSpec((tm, d_out), lambda i: (i, 0)),
        compiler_params=_params(("parallel",)),
    )(x, w1, b1.reshape(1, -1), w2, b2.reshape(1, -1))


# ----------------------------------------------------------------------------
# Fused SAGEConv('mean'):  relu?( [X | A_mean @ X] @ [Ws; Wn] + b )
# ----------------------------------------------------------------------------
def _sage_kernel(a_ref, xk_ref, xi_ref, w_ref, b_ref, o_ref, acc_ref, *, relu):
    k = pl.program_id(1)

    @pl.when(k == 0)
    def _():
        acc_ref[...] = jnp.zeros_like(acc_ref)

    acc_ref[...] += jnp.dot(a_ref[...].astype(BF16), xk_ref[...].astype(BF16),
                            preferred_element_type=F32)

    @pl.when(k == pl.num_programs(1) - 1)
    def _():
        lhs = jnp.concatenate([xi_ref[...], acc_ref[...]], axis=1).astype(BF16)
        out = jnp.dot(lhs, w_ref[...].astype(BF16),
                      preferred_element_type=F32) + b_ref[...]
        if relu:
            out = jnp.maximum(out, 0.0)
        o_ref[...] = out


def sage_conv(a_mean, x, w_cat, b, relu):
    n, d = x.shape
    tm = _row_tile(n)
    tk = _col_tile(n)
    kern = functools.partial(_sage_kernel, relu=relu)
    return pl.pallas_call(
        kern,
        out_shape=jax.ShapeDtypeStruct((n, d), F32),
        grid=(n // tm, n // tk),
        in_specs=[
            pl.BlockSpec((tm, tk), lambda i, k: (i, k)),     # A_mean tile
            pl.BlockSpec((tk, d), lambda i, k: (k, 0)),      # X rows (aggregation)
            pl.BlockSpec((tm, d), lambda i, k: (i, 0)),      # X rows (self term)
            pl.BlockSpec((2 * d, d), lambda i, k: (0, 0)),   # [Ws; Wn]
            pl.BlockSpec((1, d), lambda i, k: (0, 0)),
        ],
        out_specs=pl.BlockSpec((tm, d), lambda i, k: (i, 0)),
        scratch_shapes=[pltpu.VMEM((tm, d), F32)],
        compiler_params=_params(("parallel", "arbitrary")),
    )(a_mean, x, x, w_cat, b.reshape(1, -1))


# ----------------------------------------------------------------------------
# HyperGraphConv — fused weight computation + he = W^T X reduction
# ----------------------------------------------------------------------------
def _mm_weights_kernel(x_ref, h_ref, w_ref, he_ref, acc_ref):
    i = pl.program_id(0)

    @pl.when(i == 0)
    def _():
        acc_ref[...] = jnp.zeros_like(acc_ref)

    x = x_ref[...]
    xb = x.astype(BF16)
    logits = lax.dot_general(xb, h_ref[...].astype(BF16),
                             (((1,), (1,)), ((), ())), preferred_element_type=F32)
    logits = logits - jnp.max(logits, axis=1, keepdims=True)
    e = jnp.exp(logits)
    wts = e * pl.reciprocal(jnp.sum(e, axis=1, keepdims=True), approx=True)
    w_ref[...] = wts
    acc_ref[...] += lax.dot_general(wts.astype(BF16), xb,
                                    (((0,), (0,)), ((), ())),
                                    preferred_element_type=F32)

    @pl.when(i == pl.num_programs(0) - 1)
    def _():
        he_ref[...] = acc_ref[...]


def mm_weights_reduce(x, hyper):
    """'dot' mode: weights = softmax(x @ hyper^T); he = weights^T @ x (fused)."""
    n, d = x.shape
    n_h = hyper.shape[0]
    tm = _row_tile(n)
    return pl.pallas_call(
        _mm_weights_kernel,
        out_shape=(jax.ShapeDtypeStruct((n, n_h), F32),
                   jax.ShapeDtypeStruct((n_h, d), F32)),
        grid=(n // tm,),
        in_specs=[
            pl.BlockSpec((tm, d), lambda i: (i, 0)),
            pl.BlockSpec((n_h, d), lambda i: (0, 0)),
        ],
        out_specs=[
            pl.BlockSpec((tm, n_h), lambda i: (i, 0)),
            pl.BlockSpec((n_h, d), lambda i: (0, 0)),
        ],
        scratch_shapes=[pltpu.VMEM((n_h, d), F32)],
        compiler_params=_params(("arbitrary",)),
    )(x, hyper)


def _aa_weights_kernel(x_ref, hyp_ref, w1_ref, b1_ref, w2_ref, b2_ref,
                       w_ref, he_ref, acc_ref, *, n_h, d):
    i = pl.program_id(0)

    @pl.when(i == 0)
    def _():
        acc_ref[...] = jnp.zeros_like(acc_ref)

    x = x_ref[...]
    xb = x.astype(BF16)
    hyp = hyp_ref[...]
    w1 = w1_ref[...].astype(BF16)
    w1_h, w1_x = w1[0:d], w1[d:2 * d]
    w1_hx, w1_ab = w1[2 * d:3 * d], w1[3 * d:4 * d]
    b1 = b1_ref[...]
    w2 = w2_ref[...]           # (1, d)  second-layer weight (column vector, transposed)
    b2 = b2_ref[...]           # (1, 1)

    # terms shared across hyperedges / nodes (hoisted out of the n_h loop)
    x_proj = jnp.dot(xb, w1_x, preferred_element_type=F32)                  # (tm, d)
    h_proj = jnp.dot(hyp.astype(BF16), w1_h, preferred_element_type=F32)    # (n_h, d)

    cols = []
    for h in range(n_h):                      # n_h is small & static -> unrolled
        hrow = hyp[h][None, :]                # (1, d)
        prod = (x * hrow).astype(BF16)
        adiff = jnp.abs(hrow - x).astype(BF16)
        hid = (x_proj + h_proj[h][None, :]
               + jnp.dot(prod, w1_hx, preferred_element_type=F32)
               + jnp.dot(adiff, w1_ab, preferred_element_type=F32)
               + b1)
        hid = jnp.maximum(hid, 0.0)
        cols.append(jnp.sum(hid * w2, axis=1, keepdims=True) + b2)
    logits = jnp.concatenate(cols, axis=1)    # (tm, n_h)
    logits = logits - jnp.max(logits, axis=1, keepdims=True)
    e = jnp.exp(logits)
    wts = e * pl.reciprocal(jnp.sum(e, axis=1, keepdims=True), approx=True)
    w_ref[...] = wts
    acc_ref[...] += lax.dot_general(wts.astype(BF16), xb,
                                    (((0,), (0,)), ((), ())),
                                    preferred_element_type=F32)

    @pl.when(i == pl.num_programs(0) - 1)
    def _():
        he_ref[...] = acc_ref[...]


def aa_weights_reduce(x, hyper, w1, b1, w2, b2):
    """'mlp' mode: fused edge-MLP logits -> softmax weights; he = W^T @ x (fused)."""
    n, d = x.shape
    n_h = hyper.shape[0]
    tm = _row_tile(n)
    kern = functools.partial(_aa_weights_kernel, n_h=n_h, d=d)
    return pl.pallas_call(
        kern,
        out_shape=(jax.ShapeDtypeStruct((n, n_h), F32),
                   jax.ShapeDtypeStruct((n_h, d), F32)),
        grid=(n // tm,),
        in_specs=[
            pl.BlockSpec((tm, d), lambda i: (i, 0)),
            pl.BlockSpec((n_h, d), lambda i: (0, 0)),
            pl.BlockSpec((4 * d, d), lambda i: (0, 0)),
            pl.BlockSpec((1, d), lambda i: (0, 0)),
            pl.BlockSpec((1, d), lambda i: (0, 0)),
            pl.BlockSpec((1, 1), lambda i: (0, 0)),
        ],
        out_specs=[
            pl.BlockSpec((tm, n_h), lambda i: (i, 0)),
            pl.BlockSpec((n_h, d), lambda i: (0, 0)),
        ],
        scratch_shapes=[pltpu.VMEM((n_h, d), F32)],
        compiler_params=_params(("arbitrary",)),
    )(x, hyper, w1, b1.reshape(1, -1), w2.reshape(1, -1), b2.reshape(1, 1))


def _wt_reduce_kernel(w_ref, x_ref, he_ref, acc_ref):
    i = pl.program_id(0)

    @pl.when(i == 0)
    def _():
        acc_ref[...] = jnp.zeros_like(acc_ref)

    acc_ref[...] += lax.dot_general(w_ref[...].astype(BF16), x_ref[...].astype(BF16),
                                    (((0,), (0,)), ((), ())),
                                    preferred_element_type=F32)

    @pl.when(i == pl.num_programs(0) - 1)
    def _():
        he_ref[...] = acc_ref[...]


def weights_reduce(weights, x):
    """he = weights^T @ x  (used for the masked weights_override path)."""
    n, d = x.shape
    n_h = weights.shape[1]
    tm = _row_tile(n)
    return pl.pallas_call(
        _wt_reduce_kernel,
        out_shape=jax.ShapeDtypeStruct((n_h, d), F32),
        grid=(n // tm,),
        in_specs=[
            pl.BlockSpec((tm, n_h), lambda i: (i, 0)),
            pl.BlockSpec((tm, d), lambda i: (i, 0)),
        ],
        out_specs=pl.BlockSpec((n_h, d), lambda i: (0, 0)),
        scratch_shapes=[pltpu.VMEM((n_h, d), F32)],
        compiler_params=_params(("arbitrary",)),
    )(weights, x)


def _hyper_expand_kernel(w_ref, he_ref, wl_ref, bl_ref, o_ref):
    he2 = jnp.dot(he_ref[...].astype(BF16), wl_ref[...].astype(BF16),
                  preferred_element_type=F32)                        # (n_h, d_out)
    out = jnp.dot(w_ref[...].astype(BF16), he2.astype(BF16),
                  preferred_element_type=F32) + bl_ref[...]
    o_ref[...] = jnp.maximum(out, 0.0)


def hyper_expand(weights, he, wl, bl):
    """relu( weights @ (he @ Wl) + bl ) — reassociated HyperGraphConv apply."""
    n, n_h = weights.shape
    d_in, d_out = wl.shape
    tm = _row_tile(n)
    return pl.pallas_call(
        _hyper_expand_kernel,
        out_shape=jax.ShapeDtypeStruct((n, d_out), F32),
        grid=(n // tm,),
        in_specs=[
            pl.BlockSpec((tm, n_h), lambda i: (i, 0)),
            pl.BlockSpec((n_h, d_in), lambda i: (0, 0)),
            pl.BlockSpec((d_in, d_out), lambda i: (0, 0)),
            pl.BlockSpec((1, d_out), lambda i: (0, 0)),
        ],
        out_specs=pl.BlockSpec((tm, d_out), lambda i: (i, 0)),
        compiler_params=_params(("parallel",)),
    )(weights, he, wl, bl.reshape(1, -1))


# ----------------------------------------------------------------------------
# Fused loss kernels (per-row outputs only; no n x n HBM matrices)
# ----------------------------------------------------------------------------
def _norm_rows(z):
    inv = lax.rsqrt(jnp.maximum(jnp.sum(z * z, axis=1, keepdims=True), 1e-24))
    return z * inv   # == z / max(||z||, 1e-12)  (torch F.normalize)


def _cl_half_kernel(ai_ref, aj_ref, bj_ref, o_ref, sr, sb, dr, db, *, inv_tau, tm, tn):
    j = pl.program_id(1)

    @pl.when(j == 0)
    def _():
        sr[...] = jnp.zeros_like(sr)
        sb[...] = jnp.zeros_like(sb)
        dr[...] = jnp.zeros_like(dr)
        db[...] = jnp.zeros_like(db)

    ain = _norm_rows(ai_ref[...]).astype(BF16)
    ajn = _norm_rows(aj_ref[...]).astype(BF16)
    bjn = _norm_rows(bj_ref[...]).astype(BF16)
    e_rr = jnp.exp(lax.dot_general(ain, ajn, (((1,), (1,)), ((), ())),
                                   preferred_element_type=F32) * inv_tau)
    e_rb = jnp.exp(lax.dot_general(ain, bjn, (((1,), (1,)), ((), ())),
                                   preferred_element_type=F32) * inv_tau)
    sr[...] += jnp.sum(e_rr, axis=1, keepdims=True)
    sb[...] += jnp.sum(e_rb, axis=1, keepdims=True)
    row = pl.program_id(0) * tm + lax.broadcasted_iota(jnp.int32, (tm, tn), 0)
    col = j * tn + lax.broadcasted_iota(jnp.int32, (tm, tn), 1)
    diag = (row == col).astype(F32)
    dr[...] += jnp.sum(e_rr * diag, axis=1, keepdims=True)
    db[...] += jnp.sum(e_rb * diag, axis=1, keepdims=True)

    @pl.when(j == pl.num_programs(1) - 1)
    def _():
        denom = sr[...] + sb[...] - dr[...]
        o_ref[...] = -jnp.log(db[...] * pl.reciprocal(denom, approx=True))


def cl_half(a, b, tau):
    """Per-row contrastive half-loss:  -log(diag(f(sim(a,b))) / (rowsum f(sim(a,a)) + rowsum f(sim(a,b)) - diag f(sim(a,a))))."""
    n, d = a.shape
    tm = _row_tile(n)
    tn = _row_tile(n)
    kern = functools.partial(_cl_half_kernel, inv_tau=1.0 / tau, tm=tm, tn=tn)
    return pl.pallas_call(
        kern,
        out_shape=jax.ShapeDtypeStruct((n, 1), F32),
        grid=(n // tm, n // tn),
        in_specs=[
            pl.BlockSpec((tm, d), lambda i, j: (i, 0)),
            pl.BlockSpec((tn, d), lambda i, j: (j, 0)),
            pl.BlockSpec((tn, d), lambda i, j: (j, 0)),
        ],
        out_specs=pl.BlockSpec((tm, 1), lambda i, j: (i, 0)),
        scratch_shapes=[pltpu.VMEM((tm, 1), F32)] * 4,
        compiler_params=_params(("parallel", "arbitrary")),
    )(a, a, b)


def contrastive_loss(a_emb, b_emb, w1, b1, w2, b2, tau=0.6):
    a = mlp2(a_emb, w1, b1, w2, b2)
    b = mlp2(b_emb, w1, b1, w2, b2)
    l1 = cl_half(a, b, tau)
    l2 = cl_half(b, a, tau)
    return jnp.mean(0.5 * (l1 + l2))


def _masked_cl_kernel(z1_ref, z2_ref, o_ref, sn, sd, *, inv_temp, tm, tn):
    j = pl.program_id(1)

    @pl.when(j == 0)
    def _():
        sn[...] = jnp.zeros_like(sn)
        sd[...] = jnp.zeros_like(sd)

    z1n = _norm_rows(z1_ref[...]).astype(BF16)
    z2n = _norm_rows(z2_ref[...]).astype(BF16)
    e = jnp.exp(lax.dot_general(z1n, z2n, (((1,), (1,)), ((), ())),
                                preferred_element_type=F32) * inv_temp)
    sn[...] += jnp.sum(e, axis=1, keepdims=True)
    row = pl.program_id(0) * tm + lax.broadcasted_iota(jnp.int32, (tm, tn), 0)
    col = j * tn + lax.broadcasted_iota(jnp.int32, (tm, tn), 1)
    diag = (row == col).astype(F32)
    sd[...] += jnp.sum(e * diag, axis=1, keepdims=True)

    @pl.when(j == pl.num_programs(1) - 1)
    def _():
        o_ref[...] = -jnp.log(sd[...] * pl.reciprocal(sn[...], approx=True))


def masked_cl_rows(z1, z2, temperature):
    n, d = z1.shape
    tm = _row_tile(n)
    tn = _row_tile(n)
    kern = functools.partial(_masked_cl_kernel, inv_temp=1.0 / temperature, tm=tm, tn=tn)
    return pl.pallas_call(
        kern,
        out_shape=jax.ShapeDtypeStruct((n, 1), F32),
        grid=(n // tm, n // tn),
        in_specs=[
            pl.BlockSpec((tm, d), lambda i, j: (i, 0)),
            pl.BlockSpec((tn, d), lambda i, j: (j, 0)),
        ],
        out_specs=pl.BlockSpec((tm, 1), lambda i, j: (i, 0)),
        scratch_shapes=[pltpu.VMEM((tm, 1), F32)] * 2,
        compiler_params=_params(("parallel", "arbitrary")),
    )(z1, z2)


def _anti_kernel(ai_ref, aj_ref, wi_ref, wj_ref, o_ref, acc, *, thresh, tm, tn):
    j = pl.program_id(1)

    @pl.when(j == 0)
    def _():
        acc[...] = jnp.zeros_like(acc)

    # thresholded similarity kept in f32 (comparison semantics)
    ain = _norm_rows(ai_ref[...])
    ajn = _norm_rows(aj_ref[...])
    s = lax.dot_general(ain, ajn, (((1,), (1,)), ((), ())), preferred_element_type=F32)
    s = s * (s > thresh).astype(F32)
    win = _norm_rows(wi_ref[...]).astype(BF16)
    wjn = _norm_rows(wj_ref[...]).astype(BF16)
    ws = lax.dot_general(win, wjn, (((1,), (1,)), ((), ())), preferred_element_type=F32)
    row = pl.program_id(0) * tm + lax.broadcasted_iota(jnp.int32, (tm, tn), 0)
    col = j * tn + lax.broadcasted_iota(jnp.int32, (tm, tn), 1)
    offdiag = (row != col).astype(F32)
    acc[...] += jnp.sum(s * ws * offdiag, axis=1, keepdims=True)

    @pl.when(j == pl.num_programs(1) - 1)
    def _():
        o_ref[...] = acc[...]


def soft_anti_constraint(api_em, hyper_weights, sim_threshold=0.8):
    n = api_em.shape[0]
    tm = _row_tile(n)
    tn = _row_tile(n)
    kern = functools.partial(_anti_kernel, thresh=sim_threshold, tm=tm, tn=tn)
    row_sums = pl.pallas_call(
        kern,
        out_shape=jax.ShapeDtypeStruct((n, 1), F32),
        grid=(n // tm, n // tn),
        in_specs=[
            pl.BlockSpec((tm, api_em.shape[1]), lambda i, j: (i, 0)),
            pl.BlockSpec((tn, api_em.shape[1]), lambda i, j: (j, 0)),
            pl.BlockSpec((tm, hyper_weights.shape[1]), lambda i, j: (i, 0)),
            pl.BlockSpec((tn, hyper_weights.shape[1]), lambda i, j: (j, 0)),
        ],
        out_specs=pl.BlockSpec((tm, 1), lambda i, j: (i, 0)),
        scratch_shapes=[pltpu.VMEM((tm, 1), F32)],
        compiler_params=_params(("parallel", "arbitrary")),
    )(api_em, api_em, hyper_weights, hyper_weights)
    return jnp.sum(row_sums) / (n * n)


# ----------------------------------------------------------------------------
# Model glue
# ----------------------------------------------------------------------------
def masked_hyper_contrastive(base, weights_fn, lw, lb, key, drop_prob=0.2,
                             temperature=0.5):
    weights, _ = weights_fn(base)
    k1, k2 = jax.random.split(key)
    m1 = (jax.random.uniform(k1, weights.shape) > drop_prob).astype(F32)
    m2 = (jax.random.uniform(k2, weights.shape) > drop_prob).astype(F32)
    w1 = weights * m1
    w2 = weights * m2
    z1 = hyper_expand(w1, weights_reduce(w1, base), lw, lb)
    z2 = hyper_expand(w2, weights_reduce(w2, base), lw, lb)
    return jnp.mean(masked_cl_rows(z1, z2, temperature))


def recommender_forward(p, a_mean, mashup_em, api_em, n_mashup, key,
                        gnn_layer=3, hy_gnn_layer=3):
    all_embed = p['all_embed']
    invoke_m_emb = all_embed[:n_mashup, :]
    invoke_a_emb = all_embed[n_mashup:, :]

    mashup_content = mlp2(mashup_em, p['mm_w1'], p['mm_b1'], p['mm_w2'], p['mm_b2'])
    api_content = mlp2(api_em, p['aa_w1'], p['aa_b1'], p['aa_w2'], p['aa_b2'])

    # --- GNN (GraphSAGE) stack, eval mode: g_drop == g.  State kept as one
    #     [n_nodes, d] array; mashup/api split only at the end.
    sage1_wcat = jnp.concatenate([p['sage1_ws'], p['sage1_wn']], axis=0)
    sage2_wcat = jnp.concatenate([p['sage2_ws'], p['sage2_wn']], axis=0)
    state = all_embed
    gnn_sum = state
    for _ in range(gnn_layer):
        h = sage_conv(a_mean, state, sage1_wcat, p['sage1_b'], relu=True)
        h = sage_conv(a_mean, h, sage2_wcat, p['sage2_b'], relu=False)
        state = h + state
        gnn_sum = gnn_sum + state
    final_gnn_um = gnn_sum[:n_mashup, :]
    final_gnn_ia = gnn_sum[n_mashup:, :]

    # --- Hypergraph stacks (weights fused with W^T X reduction, apply reassociated)
    def mm_weights_fn(x):
        return mm_weights_reduce(x, p['mmh_hyper'])

    def aa_weights_fn(x):
        return aa_weights_reduce(x, p['aah_hyper'], p['aah_mlp_w1'],
                                 p['aah_mlp_b1'], p['aah_mlp_w2'], p['aah_mlp_b2'])

    hu = invoke_m_emb + mashup_content
    hi = invoke_a_emb + api_content
    hu_sum, hi_sum = hu, hi
    for _ in range(hy_gnn_layer):
        w_u, he_u = mm_weights_fn(hu)
        m_lat = hyper_expand(w_u, he_u, p['mmh_lw'], p['mmh_lb'])
        w_i, he_i = aa_weights_fn(hi)
        a_lat = hyper_expand(w_i, he_i, p['aah_lw'], p['aah_lb'])
        hu = m_lat + hu
        hi = a_lat + hi
        hu_sum = hu_sum + hu
        hi_sum = hi_sum + hi
    final_hyper_um, final_hyper_ia = hu_sum, hi_sum

    final_um_lat = jnp.concatenate([final_gnn_um, final_hyper_um], axis=-1)
    final_ia_lat = jnp.concatenate([final_gnn_ia, final_hyper_ia], axis=-1)

    # --- losses (fused per-row reduction kernels)
    k_m, k_a = jax.random.split(key)
    mask_cl_m = masked_hyper_contrastive(final_hyper_um, mm_weights_fn,
                                         p['mmh_lw'], p['mmh_lb'], k_m)
    mask_cl_a = masked_hyper_contrastive(final_hyper_ia, aa_weights_fn,
                                         p['aah_lw'], p['aah_lb'], k_a)
    m_loss = contrastive_loss(final_gnn_um, final_hyper_um,
                              p['fc1_w1'], p['fc1_b1'], p['fc1_w2'], p['fc1_b2'])
    a_loss = contrastive_loss(final_gnn_ia, final_hyper_ia,
                              p['fc2_w1'], p['fc2_b1'], p['fc2_w2'], p['fc2_b2'])
    api_hyper_weights, _ = aa_weights_fn(final_hyper_ia)
    anti_loss = soft_anti_constraint(api_em, api_hyper_weights)

    node_emd = jnp.concatenate([final_um_lat, final_ia_lat], axis=0)
    return node_emd, m_loss + a_loss + 0.5 * (mask_cl_m + mask_cl_a), anti_loss


# ----------------------------------------------------------------------------
# Deterministic parameter initialization
# ----------------------------------------------------------------------------
def init_params(key, n_nodes, dim_m, dim_a, emb, n_h):
    keys = iter(jax.random.split(key, 64))

    def xavier(shape):
        a = (6.0 / (shape[0] + shape[1])) ** 0.5
        return jax.random.uniform(next(keys), shape, F32, -a, a)

    def bias(n):
        return jax.random.uniform(next(keys), (n,), F32, -0.1, 0.1)

    p = {'all_embed': xavier((n_nodes, emb))}
    for l in (1, 2):                                  # GraphSAGE conv1/conv2
        p[f'sage{l}_ws'] = xavier((emb, emb))
        p[f'sage{l}_wn'] = xavier((emb, emb))
        p[f'sage{l}_b'] = bias(emb)
    p['mm_w1'] = xavier((dim_m, emb)); p['mm_b1'] = bias(emb)
    p['mm_w2'] = xavier((emb, emb));   p['mm_b2'] = bias(emb)
    p['aa_w1'] = xavier((dim_a, emb)); p['aa_b1'] = bias(emb)
    p['aa_w2'] = xavier((emb, emb));   p['aa_b2'] = bias(emb)
    for name in ('fc1', 'fc2'):
        p[f'{name}_w1'] = xavier((emb, emb)); p[f'{name}_b1'] = bias(emb)
        p[f'{name}_w2'] = xavier((emb, emb)); p[f'{name}_b2'] = bias(emb)
    p['mmh_hyper'] = xavier((n_h, emb))
    p['mmh_lw'] = xavier((emb, emb)); p['mmh_lb'] = bias(emb)
    p['aah_hyper'] = xavier((n_h, emb))
    p['aah_mlp_w1'] = xavier((4 * emb, emb)); p['aah_mlp_b1'] = bias(emb)
    p['aah_mlp_w2'] = xavier((emb, 1));       p['aah_mlp_b2'] = bias(1)
    p['aah_lw'] = xavier((emb, emb)); p['aah_lb'] = bias(emb)
    return p


if __name__ == "__main__":
    n_mashup, n_api = 8, 8
    n_nodes = n_mashup + n_api
    dim_m, dim_a, emb, n_h = 24, 20, 32, 4

    key = jax.random.PRNGKey(0)
    kp, kg, km, ka, kmask = jax.random.split(key, 5)

    params = init_params(kp, n_nodes, dim_m, dim_a, emb, n_h)
    mashup_em = jax.random.normal(km, (n_mashup, dim_m), F32)
    api_em = jax.random.normal(ka, (n_api, dim_a), F32)

    # random graph -> dense row-normalized adjacency (mean aggregation)
    adj = (jax.random.uniform(kg, (n_nodes, n_nodes)) < 0.3).astype(F32)
    deg = adj.sum(axis=1, keepdims=True)
    a_mean = adj / jnp.maximum(deg, 1.0)

    node_emd, cl_loss, anti_loss = recommender_forward(
        params, a_mean, mashup_em, api_em, n_mashup, kmask)
    jax.block_until_ready((node_emd, cl_loss, anti_loss))

    assert node_emd.shape == (n_nodes, 2 * emb)
    assert cl_loss.shape == () and anti_loss.shape == ()
    assert bool(jnp.isfinite(node_emd).all())
    assert bool(jnp.isfinite(cl_loss)) and bool(jnp.isfinite(anti_loss))
    print("KERNEL_OK")
</pallas_src>

<mosaic_0001>
module attributes {stable_mosaic.version = 11 : i64} {
  func.func @_mlp2_kernel(%arg0: i32, %arg1: memref<8x24xf32, #tpu.memory_space<vmem>>, %arg2: memref<24x32xf32, #tpu.memory_space<vmem>>, %arg3: memref<1x32xf32, #tpu.memory_space<vmem>>, %arg4: memref<32x32xf32, #tpu.memory_space<vmem>>, %arg5: memref<1x32xf32, #tpu.memory_space<vmem>>, %arg6: memref<8x32xf32, #tpu.memory_space<vmem>>) attributes {dimension_semantics = [#tpu.dimension_semantics<parallel>], iteration_bounds = array<i64: 1>, scalar_prefetch = 0 : i64, scratch_operands = 0 : i64, tpu.core_type = #tpu.core_type<tc>, window_params = [{transform_indices = @transform_0, window_bounds = array<i64: 8, 24>}, {pipeline_mode = #tpu.pipeline_mode<synchronous>, transform_indices = @transform_1, window_bounds = array<i64: 24, 32>}, {pipeline_mode = #tpu.pipeline_mode<synchronous>, transform_indices = @transform_2, window_bounds = array<i64: 1, 32>}, {pipeline_mode = #tpu.pipeline_mode<synchronous>, transform_indices = @transform_3, window_bounds = array<i64: 32, 32>}, {pipeline_mode = #tpu.pipeline_mode<synchronous>, transform_indices = @transform_4, window_bounds = array<i64: 1, 32>}, {transform_indices = @transform_5, window_bounds = array<i64: 8, 32>}]} {
    %c0 = arith.constant 0 : index
    %c0_0 = arith.constant 0 : index
    %0 = vector.load %arg1[%c0, %c0_0] : memref<8x24xf32, #tpu.memory_space<vmem>>, vector<8x24xf32>
    %1 = arith.truncf %0 : vector<8x24xf32> to vector<8x24xbf16>
    %c0_1 = arith.constant 0 : index
    %c0_2 = arith.constant 0 : index
    %2 = vector.load %arg2[%c0_1, %c0_2] : memref<24x32xf32, #tpu.memory_space<vmem>>, vector<24x32xf32>
    %3 = arith.truncf %2 : vector<24x32xf32> to vector<24x32xbf16>
    %cst = arith.constant dense<0.000000e+00> : vector<8x32xf32>
    %4 = tpu.matmul %1, %3, %cst {dimension_numbers = #tpu.dot_dimension_numbers<[1], [0], [0], [1], [0, 0, 1, 1], [], []>} : vector<8x24xbf16>, vector<24x32xbf16>, vector<8x32xf32> -> vector<8x32xf32>
    %c0_3 = arith.constant 0 : index
    %c0_4 = arith.constant 0 : index
    %5 = vector.load %arg3[%c0_3, %c0_4] : memref<1x32xf32, #tpu.memory_space<vmem>>, vector<1x32xf32>
    %6 = vector.broadcast %5 : vector<1x32xf32> to vector<8x32xf32>
    %7 = arith.addf %4, %6 : vector<8x32xf32>
    %cst_5 = arith.constant 0.000000e+00 : f32
    %8 = vector.broadcast %cst_5 : f32 to vector<8x32xf32>
    %9 = arith.maximumf %7, %8 : vector<8x32xf32>
    %10 = arith.truncf %9 : vector<8x32xf32> to vector<8x32xbf16>
    %c0_6 = arith.constant 0 : index
    %c0_7 = arith.constant 0 : index
    %11 = vector.load %arg4[%c0_6, %c0_7] : memref<32x32xf32, #tpu.memory_space<vmem>>, vector<32x32xf32>
    %12 = arith.truncf %11 : vector<32x32xf32> to vector<32x32xbf16>
    %cst_8 = arith.constant dense<0.000000e+00> : vector<8x32xf32>
    %13 = tpu.matmul %10, %12, %cst_8 {dimension_numbers = #tpu.dot_dimension_numbers<[1], [0], [0], [1], [0, 0, 1, 1], [], []>} : vector<8x32xbf16>, vector<32x32xbf16>, vector<8x32xf32> -> vector<8x32xf32>
    %c0_9 = arith.constant 0 : index
    %c0_10 = arith.constant 0 : index
    %14 = vector.load %arg5[%c0_9, %c0_10] : memref<1x32xf32, #tpu.memory_space<vmem>>, vector<1x32xf32>
    %15 = vector.broadcast %14 : vector<1x32xf32> to vector<8x32xf32>
    %16 = arith.addf %13, %15 : vector<8x32xf32>
    %c0_11 = arith.constant 0 : index
    %c0_12 = arith.constant 0 : index
    %17 = vector.load %arg6[%c0_11, %c0_12] : memref<8x32xf32, #tpu.memory_space<vmem>>, vector<8x32xf32>
    tpu.vector_store %arg6[%c0_11, %c0_12], %16 {strides = array<i32>} : memref<8x32xf32, #tpu.memory_space<vmem>>, vector<8x32xf32>,
    return
  }
  func.func @transform_0(%arg0: i32) -> (i32, i32) {
    %c0_i32 = arith.constant 0 : i32
    %c0_i32_0 = arith.constant 0 : i32
    return %arg0, %c0_i32 : i32, i32
  }
  func.func @transform_1(%arg0: i32) -> (i32, i32) {
    %c0_i32 = arith.constant 0 : i32
    %c0_i32_0 = arith.constant 0 : i32
    %c0_i32_1 = arith.constant 0 : i32
    return %c0_i32, %c0_i32_0 : i32, i32
  }
  func.func @transform_2(%arg0: i32) -> (i32, i32) {
    %c0_i32 = arith.constant 0 : i32
    %c0_i32_0 = arith.constant 0 : i32
    %c0_i32_1 = arith.constant 0 : i32
    return %c0_i32, %c0_i32_0 : i32, i32
  }
  func.func @transform_3(%arg0: i32) -> (i32, i32) {
    %c0_i32 = arith.constant 0 : i32
    %c0_i32_0 = arith.constant 0 : i32
    %c0_i32_1 = arith.constant 0 : i32
    return %c0_i32, %c0_i32_0 : i32, i32
  }
  func.func @transform_4(%arg0: i32) -> (i32, i32) {
    %c0_i32 = arith.constant 0 : i32
    %c0_i32_0 = arith.constant 0 : i32
    %c0_i32_1 = arith.constant 0 : i32
    return %c0_i32, %c0_i32_0 : i32, i32
  }
  func.func @transform_5(%arg0: i32) -> (i32, i32) {
    %c0_i32 = arith.constant 0 : i32
    %c0_i32_0 = arith.constant 0 : i32
    return %arg0, %c0_i32 : i32, i32
  }
}

</mosaic_0001>

<bundles_post_ra>
// kernel: tpu_custom_call.1
= control target key start
LH: loop header
LB: loop body
LE: loop exit
PB: predicated region body
PF: predicated region fallthrough
CT: control target
= control target key end

     0   :  { %10 = vsyncpa [#allocation3], 0  ;;  %s425_s0 = inlined_call_operand.hbm [shape: f32[8,24], index: 0, kind: input, shape index: {}]   ;;  %s426_s1 = inlined_call_operand.hbm [shape: f32[24,32], index: 1, kind: input, shape index: {}]   ;;  %s427_s2 = inlined_call_operand.vmem [shape: f32[1,32], index: 2, kind: input, shape index: {}]   ;;  %s428_s3 = inlined_call_operand.hbm [shape: f32[32,32], index: 3, kind: input, shape index: {}]   ;;  %s429_s4 = inlined_call_operand.vmem [shape: f32[1,32], index: 4, kind: input, shape index: {}]   ;;  %s430_s5 = inlined_call_operand.hbm [shape: f32[8,32], index: 5, kind: output, shape index: {}]  }
   0x1   :  { %11 = vsyncpa [#allocation6], 0 }
   0x2   :  { %12 = vsyncpa [#allocation4], 0  ;;  %s327_s18 = smov [#allocation5]   ;;  %s233_s22 = scalar_lea.hbm %s426_s1, 384 }
   0x3   :  { %s28_s19 = sshll.u32 %s327_s18, 4  ;;  %p234_p0 = scmp.ne.s32.totalorder %s426_s1, %s233_s22  ;;  %s29_s19 = int_to_ptr.vmem [resolvable:$true] %s28_s19 }
   0x4   :  { %p237_p1 = scmp.lt.u32.totalorder %s233_s22, %s426_s1 }
   0x6   :  { %p239_p2 = pnand %p237_p1, %p234_p0 }
   0x8   :  { %242 = shalt.err (!%p239_p2)
}
   0x9   :  { %s243_s27 = scalar_lea.vmem %s29_s19, 384  ;;  %p248_p4 = scmp.lt.s32.totalorder %s29_s19, %s29_s19 }
   0xa   :  { %p244_p3 = scmp.ne.s32.totalorder %s29_s19, %s243_s27  ;;  %p249_p5 = scmp.lt.s32.totalorder %s243_s27, %s243_s27 }
   0xc   :  { %p250_p6 = por %p249_p5, %p248_p4 }
   0xe   :  { %p251_p7 = pnand %p250_p6, %p244_p3 }
  0x10   :  { %254 = shalt.err (!%p251_p7)
}
  0x11   :  { %s328_s28 = smov 128   ;;  %s329_s29 = smov 8  }
  0x12   :  { %34 = dma.hbm_to_vmem [thread:$0]  %s426_s1, 384, %s29_s19, [#allocation6], %s328_s28, %s328_s28, %s329_s29  }
  0x13   :  { %s330_s7 = smov [#allocation2]   ;;  %s331_s9 = smov [#allocation7]  }
  0x14   :  { %s19_s8 = sshll.u32 %s330_s7, 4  ;;  %s42_s10 = sshll.u32 %s331_s9, 4  ;;  %s20_s8 = int_to_ptr.vmem [resolvable:$true] %s19_s8  ;;  %s43_s10 = int_to_ptr.vmem [resolvable:$true] %s42_s10 }
  0x15   :  { %s255_s13 = scalar_lea.hbm %s425_s0, 128 }
  0x16   :  { %p256_p8 = scmp.ne.s32.totalorder %s425_s0, %s255_s13  ;;  %p259_p9 = scmp.lt.u32.totalorder %s255_s13, %s425_s0 }
  0x18   :  { %p261_p10 = pnand %p259_p9, %p256_p8 }
  0x1a   :  { %264 = shalt.err (!%p261_p10)
}
  0x1b   :  { %s265_s1 = scalar_lea.vmem %s20_s8, 128  ;;  %p270_p12 = scmp.lt.s32.totalorder %s20_s8, %s20_s8 }
  0x1c   :  { %p266_p11 = scmp.ne.s32.totalorder %s20_s8, %s265_s1  ;;  %p271_p13 = scmp.lt.s32.totalorder %s265_s1, %s265_s1 }
  0x1e   :  { %p272_p0 = por %p271_p13, %p270_p12 }
  0x20   :  { %p273_p1 = pnand %p272_p0, %p266_p11 }
  0x22   :  { %276 = shalt.err (!%p273_p1)
}
  0x23   :  { %22 = dma.hbm_to_vmem [thread:$0]  %s425_s0, 128, %s20_s8, [#allocation3]  }
  0x24   :  { %s277_s22 = scalar_lea.hbm %s428_s3, 512 }
  0x25   :  { %p278_p2 = scmp.ne.s32.totalorder %s428_s3, %s277_s22  ;;  %p281_p3 = scmp.lt.u32.totalorder %s277_s22, %s428_s3 }
  0x27   :  { %p283_p4 = pnand %p281_p3, %p278_p2 }
  0x29   :  { %286 = shalt.err (!%p283_p4)
}
  0x2a   :  { %s287_s27 = scalar_lea.vmem %s43_s10, 512  ;;  %p292_p6 = scmp.lt.s32.totalorder %s43_s10, %s43_s10 }
  0x2b   :  { %p288_p5 = scmp.ne.s32.totalorder %s43_s10, %s287_s27  ;;  %p293_p7 = scmp.lt.s32.totalorder %s287_s27, %s287_s27 }
  0x2d   :  { %p294_p8 = por %p293_p7, %p292_p6 }
  0x2f   :  { %p295_p9 = pnand %p294_p8, %p288_p5 }
  0x31   :  { %298 = shalt.err (!%p295_p9)
}
  0x32   :  { %48 = dma.hbm_to_vmem [thread:$0]  %s428_s3, 512, %s43_s10, [#allocation6], %s328_s28, %s328_s28, %s329_s29  }
  0x33   :  { %321 = dma.done.wait [#allocation3], 128  }
  0x34   :  { %322 = vsyncadd [#allocation3], 4294967168 }
  0x35   :  { %323 = dma.done.wait [#allocation6], 896  }
  0x36   :  { %324 = vsyncadd [#allocation6], 4294966400  ;;  %v332_v0 = vmov 0.0   ;;  %vm333_vm0 = vmmov 0   ;;  %v63_v1 = vld [vmem:[#allocation5] sm:$0xff]  ;;  %v64_v2 = vld [vmem:[#allocation5 + $0x8] sm:$0xff] }
  0x37   :  { %209 = vmatprep.subr.bf16.mxu0 %v332_v0  ;;  %213 = vmatprep.mubr.msk.bf16.mxu0 %vm333_vm0, %v332_v0  ;;  %v65_v3 = vld [vmem:[#allocation5 + $0x10] sm:$0xff]  ;;  %v66_v4 = vpack.c.bf16 %v64_v2, %v63_v1  ;;  %vm79_vm1 = vcmask 1043456   ;;  %v61_v6 = vld [vmem:[#allocation2] sm:$0xff]  ;;  %vm75_vm2 = vcmask 195584   ;;  %v126_v10 = vld [vmem:[#allocation7 + $0x8] sm:$0xff]  ;;  %vm138_vm3 = vcmask 261120  }
  0x38   :  { %217 = vmatprep.subr.bf16.mxu1 %v332_v0  ;;  %221 = vmatprep.mubr.msk.bf16.mxu1 %vm333_vm0, %v332_v0  ;;  %v67_v5 = vpack.c.bf16 %v65_v3, %v65_v3  ;;  %v62_v8 = vpack.c.bf16 %v61_v6, %v61_v6  ;;  %v125_v9 = vld [vmem:[#allocation7] sm:$0xff]  ;;  %v127_v12 = vld [vmem:[#allocation7 + $0x10] sm:$0xff]  ;;  %v128_v13 = vld [vmem:[#allocation7 + $0x18] sm:$0xff]  ;;  %s334_s7 = smov [#allocation8]  }
  0x39   :  { %210 = vmatpush3.bf16.msra.mxu0 %v66_v4  ;;  %v129_v11 = vpack.c.bf16 %v126_v10, %v125_v9  ;;  %v130_v14 = vpack.c.bf16 %v128_v13, %v127_v12  ;;  %v199_v15 = vld [vmem:[%s427_s2] ss:$0 sm:$0xff]  ;;  %s189_s8 = sshll.u32 %s334_s7, 4  ;;  %s190_s8 = int_to_ptr.vmem [resolvable:$true] %s189_s8 }
  0x3a   :  { %211 = vmatprep.subr.bf16.mxu0 %v332_v0  ;;  %v81_v7 = vsel %vm79_vm1, %v67_v5, 0  ;;  %v201_v23 = vld [vmem:[%s429_s4] ss:$0 sm:$0xff]  ;;  %s299_s2 = scalar_lea.vmem %s190_s8, 128  ;;  %p304_p11 = scmp.lt.s32.totalorder %s190_s8, %s190_s8 }
  0x3b   :  { %218 = vmatpush3.bf16.msra.mxu1 %v129_v11  ;;  %p300_p10 = scmp.ne.s32.totalorder %s190_s8, %s299_s2  ;;  %p305_p12 = scmp.lt.s32.totalorder %s299_s2, %s299_s2 }
  0x3c   :  { %219 = vmatprep.subr.bf16.mxu1 %v332_v0 }
  0x3d   :  { %212 = vmatpush3.bf16.msra.mxu0 %v81_v7  ;;  %p306_p13 = por %p305_p12, %p304_p11 }
  0x3f   :  { %220 = vmatpush3.bf16.msra.mxu1 %v130_v14  ;;  %p307_p0 = pnand %p306_p13, %p300_p10 }
  0x40   :  { %214 = vmatmul.mubr.msk.bf16.vlgmr.msra.gmra.mrb[0].mxu0 %vm75_vm2, %v62_v8 }
 0x113   :  { %v117_v16 = vpop.f32.mrb[0].mxu0 }
 0x114   :  { %v118_v17 = vadd.f32 %v199_v15, %v117_v16  ;;  %v215_v18 = vpop.f32.mrb[1].mxu0 }
 0x115   :  { %v120_v19 = vpop.f32.mrb[2].mxu0 }
 0x116   :  { %v123_v20 = vmax.f32 %v118_v17, 0.0  ;;  %v216_v21 = vpop.f32.mrb[3].mxu0 }
 0x118   :  { %v124_v22 = vpack.c.bf16 %v123_v20, %v123_v20 }
 0x11a   :  { %222 = vmatmul.mubr.msk.bf16.vlgmr.msra.gmra.mrb[0].mxu1 %vm138_vm3, %v124_v22 }
 0x1ed   :  { %v176_v24 = vpop.f32.mrb[0].mxu1 }
 0x1ee   :  { %v177_v25 = vadd.f32 %v201_v23, %v176_v24  ;;  %v223_v26 = vpop.f32.mrb[1].mxu1 }
 0x1ef   :  { %v179_v27 = vpop.f32.mrb[2].mxu1 }
 0x1f0   :  { %182 = vst.msk [vmem:[#allocation8] sm:$0xff] %vm138_vm3, %v177_v25  ;;  %v224_v28 = vpop.f32.mrb[3].mxu1 }
 0x1f1   :  { %310 = shalt.err (!%p307_p0)
}
 0x1f2   :  { %s311_s4 = scalar_lea.hbm %s430_s5, 128 }
 0x1f3   :  { %p312_p1 = scmp.ne.s32.totalorder %s430_s5, %s311_s4  ;;  %p315_p2 = scmp.lt.u32.totalorder %s311_s4, %s430_s5 }
 0x1f5   :  { %p317_p3 = pnand %p315_p2, %p312_p1 }
 0x1f7   :  { %320 = shalt.err (!%p317_p3)
}
 0x1f8   :  { %192 = dma.vmem_to_hbm [thread:$0]  %s190_s8, 128, %s430_s5, [#allocation4]  }
 0x1f9   :  { %325 = dma.done.wait [#allocation4], 128  }
 0x1fa   :  { %326 = vsyncadd [#allocation4], 4294967168 }
 0x1fb   :  { %196 = vsyncpa [#allocation3], 1 }
 0x1fc   :  { %197 = vsyncpa [#allocation6], 1 }
 0x1fd   :  { %198 = vsyncpa [#allocation4], 1 }

</bundles_post_ra>
